<compile_context>
chip_gen: v5e
topology: v5e:2x2
jax: 0.10.0
libtpu: 0.0.40
codegen_flags: <defaults>
</compile_context>

<pallas_src>
import functools

import jax
import jax.numpy as jnp
from jax import lax
from jax.experimental import pallas as pl
from jax.experimental.pallas import tpu as pltpu

_TEMPERATURE = 1.0 / 5.0


def _approx_kl_kernel(x_ref, t_ref, o_ref, *, n_total, tile_n):
    pid = pl.program_id(0)

    x = x_ref[...].astype(jnp.float32) * _TEMPERATURE          # (TILE_N, C)
    t = t_ref[...].astype(jnp.float32)                          # (TILE_N, C)

    # numerically stable softmax statistics along the class (lane) axis
    m = jnp.max(x, axis=1, keepdims=True)                       # (TILE_N, 1)
    shifted = x - m
    ex = jnp.exp(shifted)
    denom = jnp.sum(ex, axis=1, keepdims=True)                   # (TILE_N, 1)
    s1 = jnp.sum(ex * shifted, axis=1, keepdims=True)            # sum(ex*sh)
    s2 = jnp.sum(ex * t, axis=1, keepdims=True)                  # sum(ex*t)

    # algebra-rewritten fused row value:
    #   sum(p*logp) - T*sum(p*t) == (s1 - T*s2)/denom - log(denom)
    # (approx=False keeps the division exact so the result tracks the f32
    #  reference at rtol=1e-5; it is per-row only, so there is no perf cost.)
    row_val = (s1 - _TEMPERATURE * s2) * pl.reciprocal(denom, approx=False) \
        - jnp.log(denom)

    # mask padded rows of the (possibly ragged) last tile AFTER the row
    # reductions; any NaN/Inf from stale out-of-bounds data is discarded here.
    row_ids = pid * tile_n + lax.broadcasted_iota(jnp.int32, (tile_n, 1), 0)
    row_val = jnp.where(row_ids < n_total, row_val, 0.0)

    partial = jnp.sum(row_val)                                   # scalar f32

    # lane-dense (8, 128) per-tile output block: partial at [0, 0], zeros
    # elsewhere, so the wrapper can simply sum the whole slab.  (A few VPU ops
    # on a single vreg per step — off the critical path.)
    sub = lax.broadcasted_iota(jnp.int32, (8, 128), 0)
    lane = lax.broadcasted_iota(jnp.int32, (8, 128), 1)
    o_ref[...] = jnp.where((sub == 0) & (lane == 0), partial, 0.0)


def _round_up(v, a):
    return ((v + a - 1) // a) * a


def approximate_kl_loss(inputs: jax.Array, targets: jax.Array,
                        *, tile_n=None) -> jax.Array:
    assert inputs.shape == targets.shape
    assert inputs.ndim == 2, "kernel expects (N, C) layout (softmax over C)"
    n, c = inputs.shape

    itemsize = jnp.dtype(inputs.dtype).itemsize
    row_align = 16 if itemsize == 2 else 8          # bf16 sublane packing
    padded_c = _round_up(c, 128)                    # real lane footprint

    # ---- generation-aware VMEM sizing -------------------------------------
    # v5e/v6e: 128 MiB physical; v7x: 64 MiB.  Use ~70% as the scoped limit
    # (<= 96 MiB), and give the streamed inputs + in-kernel f32 temporaries a
    # bit over half of that.
    try:
        vmem_cap = int(getattr(pltpu.get_tpu_info(), "vmem_capacity_bytes",
                               128 * 1024 * 1024))
    except Exception:  # pragma: no cover - CPU / old runtime fallback
        vmem_cap = 128 * 1024 * 1024
    vmem_limit = min(96 * 1024 * 1024, (vmem_cap * 7) // 10)

    if tile_n is None:
        # per-row VMEM cost: 2 inputs x 2 pipeline buffers (input dtype) plus
        # ~4 live full-tile f32 temporaries inside the kernel body, all at the
        # lane-PADDED width.
        per_row_bytes = padded_c * (4 * itemsize + 4 * 4)
        working = min((vmem_limit * 55) // 100, 48 * 1024 * 1024)
        tile_n = max(row_align, working // per_row_bytes)

    # alignment + never larger than the (alignment-rounded) batch
    tile_n = max(row_align, (int(tile_n) // row_align) * row_align)
    tile_n = min(tile_n, _round_up(n, row_align))

    # keep >= 2 grid tiles for large batches so v7x's 2 TensorCores both get
    # work (dimension_semantics=("parallel",)); near-free on 1-TC chips.
    if n >= 256:
        tile_n = min(tile_n, _round_up(pl.cdiv(n, 2), row_align))
    tile_n = max(row_align, tile_n)

    num_tiles = pl.cdiv(n, tile_n)

    partials = pl.pallas_call(
        functools.partial(_approx_kl_kernel, n_total=n, tile_n=tile_n),
        out_shape=jax.ShapeDtypeStruct((num_tiles * 8, 128), jnp.float32),
        grid=(num_tiles,),
        in_specs=[
            pl.BlockSpec((tile_n, c), lambda i: (i, 0)),
            pl.BlockSpec((tile_n, c), lambda i: (i, 0)),
        ],
        out_specs=pl.BlockSpec((8, 128), lambda i: (i, 0)),
        compiler_params=pltpu.CompilerParams(
            dimension_semantics=("parallel",),
            vmem_limit_bytes=int(vmem_limit),
        ),
    )(inputs, targets)

    # final reduction + division by the FULL batch size happen in JAX
    return jnp.sum(partials) / jnp.float32(n)


def _reference(inputs, targets):
    t = 1.0 / 5.0
    x = inputs.astype(jnp.float32) * t
    p = jax.nn.softmax(x, axis=1)
    logp = jax.nn.log_softmax(x, axis=1)
    val = p * logp - p * (t * targets.astype(jnp.float32))
    return jnp.sum(val) / inputs.shape[0]


if __name__ == "__main__":
    key = jax.random.PRNGKey(0)
    k1, k2, k3, k4, k5, k6 = jax.random.split(key, 6)

    # primary small shape, matching the module's (N, C) softmax-over-C layout
    n, c = 8, 32
    inputs = jax.random.normal(k1, (n, c), dtype=jnp.float32)
    targets = jax.random.normal(k2, (n, c), dtype=jnp.float32)
    loss = approximate_kl_loss(inputs, targets)
    jax.block_until_ready(loss)
    ref = _reference(inputs, targets)
    assert jnp.allclose(loss, ref, rtol=1e-5, atol=1e-5), (loss, ref)

    # multi-tile + ragged path: N not a multiple of TILE_N, grid > 1
    n2, c2 = 20, 32
    inputs2 = jax.random.normal(k3, (n2, c2), dtype=jnp.float32)
    targets2 = jax.random.normal(k4, (n2, c2), dtype=jnp.float32)
    loss2 = approximate_kl_loss(inputs2, targets2, tile_n=8)
    jax.block_until_ready(loss2)
    ref2 = _reference(inputs2, targets2)
    assert jnp.allclose(loss2, ref2, rtol=1e-5, atol=1e-5), (loss2, ref2)

    # larger batch: exercises auto tile sizing, the >=2-tile megacore clamp,
    # a ragged last tile, and multi-vreg lane width.
    n3, c3 = 300, 256
    inputs3 = jax.random.normal(k5, (n3, c3), dtype=jnp.float32)
    targets3 = jax.random.normal(k6, (n3, c3), dtype=jnp.float32)
    loss3 = approximate_kl_loss(inputs3, targets3)
    jax.block_until_ready(loss3)
    ref3 = _reference(inputs3, targets3)
    assert jnp.allclose(loss3, ref3, rtol=1e-5, atol=1e-5), (loss3, ref3)

    print("KERNEL_OK")
</pallas_src>

<mosaic_0001>
module attributes {stable_mosaic.version = 11 : i64} {
  func.func @_approx_kl_kernel(%arg0: i32, %arg1: memref<8x32xf32, #tpu.memory_space<vmem>>, %arg2: memref<8x32xf32, #tpu.memory_space<vmem>>, %arg3: memref<8x128xf32, #tpu.memory_space<vmem>>) attributes {dimension_semantics = [#tpu.dimension_semantics<parallel>], iteration_bounds = array<i64: 1>, scalar_prefetch = 0 : i64, scratch_operands = 0 : i64, tpu.core_type = #tpu.core_type<tc>, window_params = [{transform_indices = @transform_0, window_bounds = array<i64: 8, 32>}, {transform_indices = @transform_1, window_bounds = array<i64: 8, 32>}, {transform_indices = @transform_2, window_bounds = array<i64: 8, 128>}]} {
    %c0 = arith.constant 0 : index
    %c0_0 = arith.constant 0 : index
    %0 = vector.load %arg1[%c0, %c0_0] : memref<8x32xf32, #tpu.memory_space<vmem>>, vector<8x32xf32>
    %cst = arith.constant 2.000000e-01 : f32
    %1 = vector.broadcast %cst : f32 to vector<8x32xf32>
    %2 = arith.mulf %0, %1 : vector<8x32xf32>
    %c0_1 = arith.constant 0 : index
    %c0_2 = arith.constant 0 : index
    %3 = vector.load %arg2[%c0_1, %c0_2] : memref<8x32xf32, #tpu.memory_space<vmem>>, vector<8x32xf32>
    %cst_3 = arith.constant dense<0xFF800000> : vector<8xf32>
    %4 = vector.multi_reduction <maximumf>, %2, %cst_3 [1] : vector<8x32xf32> to vector<8xf32>
    %5 = vector.shape_cast %4 : vector<8xf32> to vector<8x1xf32>
    %6 = vector.broadcast %5 : vector<8x1xf32> to vector<8x32xf32>
    %7 = arith.subf %2, %6 : vector<8x32xf32>
    %8 = math.exp %7 : vector<8x32xf32>
    %cst_4 = arith.constant dense<0.000000e+00> : vector<8xf32>
    %9 = vector.multi_reduction <add>, %8, %cst_4 [1] : vector<8x32xf32> to vector<8xf32>
    %10 = vector.shape_cast %9 : vector<8xf32> to vector<8x1xf32>
    %11 = arith.mulf %8, %7 : vector<8x32xf32>
    %cst_5 = arith.constant dense<0.000000e+00> : vector<8xf32>
    %12 = vector.multi_reduction <add>, %11, %cst_5 [1] : vector<8x32xf32> to vector<8xf32>
    %13 = vector.shape_cast %12 : vector<8xf32> to vector<8x1xf32>
    %14 = arith.mulf %8, %3 : vector<8x32xf32>
    %cst_6 = arith.constant dense<0.000000e+00> : vector<8xf32>
    %15 = vector.multi_reduction <add>, %14, %cst_6 [1] : vector<8x32xf32> to vector<8xf32>
    %16 = vector.shape_cast %15 : vector<8xf32> to vector<8x1xf32>
    %cst_7 = arith.constant 2.000000e-01 : f32
    %17 = vector.broadcast %cst_7 : f32 to vector<8x1xf32>
    %18 = arith.mulf %17, %16 : vector<8x1xf32>
    %19 = arith.subf %13, %18 : vector<8x1xf32>
    %20 = tpu.reciprocal %10 : vector<8x1xf32> -> vector<8x1xf32>
    %21 = arith.mulf %19, %20 : vector<8x1xf32>
    %22 = math.log %10 : vector<8x1xf32>
    %23 = arith.subf %21, %22 : vector<8x1xf32>
    %c8_i32 = arith.constant 8 : i32
    %24 = arith.muli %arg0, %c8_i32 : i32
    %25 = tpu.iota {dimensions = array<i32: 0>} : vector<8x1xi32>
    %26 = vector.broadcast %24 : i32 to vector<8x1xi32>
    %27 = arith.addi %26, %25 : vector<8x1xi32>
    %c8_i32_8 = arith.constant 8 : i32
    %28 = vector.broadcast %c8_i32_8 : i32 to vector<8x1xi32>
    %29 = arith.cmpi slt, %27, %28 : vector<8x1xi32>
    %cst_9 = arith.constant 0.000000e+00 : f32
    %30 = vector.broadcast %cst_9 : f32 to vector<8x1xf32>
    %31 = arith.select %29, %23, %30 : vector<8x1xi1>, vector<8x1xf32>
    %32 = vector.shape_cast %31 : vector<8x1xf32> to vector<1x8x1xf32>
    %cst_10 = arith.constant dense<0.000000e+00> : vector<1xf32>
    %33 = vector.multi_reduction <add>, %32, %cst_10 [1, 2] : vector<1x8x1xf32> to vector<1xf32>
    %34 = vector.shape_cast %33 : vector<1xf32> to vector<1x1x1xf32>
    %35 = vector.extract %34[0, 0, 0] : f32 from vector<1x1x1xf32>
    %36 = tpu.iota {dimensions = array<i32: 0>} : vector<8x128xi32>
    %37 = tpu.iota {dimensions = array<i32: 1>} : vector<8x128xi32>
    %c0_i32 = arith.constant 0 : i32
    %38 = vector.broadcast %c0_i32 : i32 to vector<8x128xi32>
    %39 = arith.cmpi eq, %36, %38 : vector<8x128xi32>
    %c0_i32_11 = arith.constant 0 : i32
    %40 = vector.broadcast %c0_i32_11 : i32 to vector<8x128xi32>
    %41 = arith.cmpi eq, %37, %40 : vector<8x128xi32>
    %42 = arith.andi %39, %41 : vector<8x128xi1>
    %cst_12 = arith.constant 0.000000e+00 : f32
    %43 = vector.broadcast %35 : f32 to vector<8x128xf32>
    %44 = vector.broadcast %cst_12 : f32 to vector<8x128xf32>
    %45 = arith.select %42, %43, %44 : vector<8x128xi1>, vector<8x128xf32>
    %c0_13 = arith.constant 0 : index
    %c0_14 = arith.constant 0 : index
    %46 = vector.load %arg3[%c0_13, %c0_14] : memref<8x128xf32, #tpu.memory_space<vmem>>, vector<8x128xf32>
    tpu.vector_store %arg3[%c0_13, %c0_14], %45 {strides = array<i32>} : memref<8x128xf32, #tpu.memory_space<vmem>>, vector<8x128xf32>,
    return
  }
  func.func @transform_0(%arg0: i32) -> (i32, i32) {
    %c0_i32 = arith.constant 0 : i32
    %c0_i32_0 = arith.constant 0 : i32
    return %arg0, %c0_i32 : i32, i32
  }
  func.func @transform_1(%arg0: i32) -> (i32, i32) {
    %c0_i32 = arith.constant 0 : i32
    %c0_i32_0 = arith.constant 0 : i32
    return %arg0, %c0_i32 : i32, i32
  }
  func.func @transform_2(%arg0: i32) -> (i32, i32) {
    %c0_i32 = arith.constant 0 : i32
    %c0_i32_0 = arith.constant 0 : i32
    return %arg0, %c0_i32 : i32, i32
  }
}

</mosaic_0001>

<bundles_post_ra>
// kernel: tpu_custom_call.1
= control target key start
LH: loop header
LB: loop body
LE: loop exit
PB: predicated region body
PF: predicated region fallthrough
CT: control target
= control target key end

     0   :  { %7 = vsyncpa [#allocation3], 0  ;;  %s245_s0 = inlined_call_operand.hbm [shape: f32[8,32], index: 0, kind: input, shape index: {}]   ;;  %s246_s1 = inlined_call_operand.hbm [shape: f32[8,32], index: 1, kind: input, shape index: {}]   ;;  %s247_s2 = inlined_call_operand.hbm [shape: f32[8,128], index: 2, kind: output, shape index: {}]  }
   0x1   :  { %8 = vsyncpa [#allocation6], 0 }
   0x2   :  { %9 = vsyncpa [#allocation4], 0  ;;  %s15_s11 = sshll.u32 %s245_s0, 4  ;;  %s214_s12 = smov [#allocation2]   ;;  %s16_s11 = int_to_ptr.hbm [resolvable:$true] %s15_s11 }
   0x3   :  { %s17_s13 = sshll.u32 %s214_s12, 4  ;;  %s26_s16 = sshll.u32 %s246_s1, 4  ;;  %s18_s13 = int_to_ptr.vmem [resolvable:$true] %s17_s13  ;;  %s27_s16 = int_to_ptr.hbm [resolvable:$true] %s26_s16 }
   0x4   :  { %20 = dma.hbm_to_vmem [thread:$0]  %s16_s11, 128, %s18_s13, [#allocation3]  }
   0x5   :  { %s215_s17 = smov [#allocation5]  }
   0x6   :  { %s28_s18 = sshll.u32 %s215_s17, 4  ;;  %s29_s18 = int_to_ptr.vmem [resolvable:$true] %s28_s18 }
   0x7   :  { %31 = dma.hbm_to_vmem [thread:$0]  %s27_s16, 128, %s29_s18, [#allocation6]  }
   0x8   :  { %208 = dma.done.wait [#allocation3], 128  }
   0x9   :  { %209 = vsyncadd [#allocation3], 4294967168 }
   0xa   :  { %210 = dma.done.wait [#allocation6], 128  }
   0xb   :  { %211 = vsyncadd [#allocation6], 4294967168  ;;  %v40_v0 = vld [vmem:[#allocation2] sm:$0xff]  ;;  %vm43_vm0 = vcmask 261120   ;;  %v42_v6 = vld [vmem:[#allocation5] sm:$0xff]  ;;  %vm88_vm5 = vcmask 7168   ;;  %v82_v40 = vlaneseq }
   0xc   :  { %v41_v1 = vmul.f32 0.2, %v40_v0  ;;  %s216_s0 = smov [#allocation7]   ;;  %s114_s21 = sshll.u32 %s247_s2, 4  ;;  %s115_s21 = int_to_ptr.hbm [resolvable:$true] %s114_s21 }
   0xd   :  { %v83_v41 = vshrl.u32 %v82_v40, 7  ;;  %v100_v42 = vand.u32 127, %v82_v40  ;;  %s112_s1 = sshll.u32 %s216_s0, 4  ;;  %s113_s1 = int_to_ptr.vmem [resolvable:$true] %s112_s1 }
   0xe   :  { %v44_v2 = vsel %vm43_vm0, %v41_v1, -inf }
   0xf   :  { %45 = vmax.xlane.f32.xlu0 %v44_v2  ;;  %vm101_vm6 = vcmp.eq.s32.totalorder %v83_v41, 0  ;;  %vm102_vm7 = vcmp.eq.s32.totalorder %v100_v42, 0 }
  0x10   :  { %vm103_vm8 = vmand %vm101_vm6, %vm102_vm7 }
  0x82   :  { %v46_v3 = vpop.xlane.xlu0 %45 }
  0x83   :  { %v47_v4 = vsub.f32 %v41_v1, %v46_v3 }
  0x85   :  { %v48_v5 = vmul.f32 1.442695, %v47_v4 }
  0x87   :  { %130 = vpow2.f32 %v48_v5 }
  0x8d   :  { %v131_v7 = vpop.eup %130 }
  0x8e   :  { %v50_v8 = vsel %vm43_vm0, %v131_v7, 0.0  ;;  %v57_v9 = vmul.f32 %v131_v7, %v42_v6  ;;  %v53_v11 = vmul.f32 %v131_v7, %v47_v4 }
  0x8f   :  { %51 = vadd.xlane.f32.xlu0 %v50_v8 }
  0x90   :  { %v58_v10 = vsel %vm43_vm0, %v57_v9, 0.0  ;;  %v54_v12 = vsel %vm43_vm0, %v53_v11, 0.0 }
  0x91   :  { %59 = vadd.xlane.f32.xlu1 %v58_v10 }
  0x99   :  { %55 = vadd.xlane.f32.xlu1 %v54_v12 }
 0x102   :  { %v52_v13 = vpop.xlane.xlu0 %51 }
 0x103   :  { %132 = vrcp.f32 %v52_v13  ;;  %v74_v18 = vand.u32 2147483648, %v52_v13  ;;  %v72_v20 = vand.u32 2147483647, %v52_v13  ;;  %vm68_vm2 = vweird.f32 %v52_v13 }
 0x104   :  { %v60_v14 = vpop.xlane.xlu1 %59  ;;  %134 = vlog2.f32 %v52_v13 }
 0x105   :  { %v61_v22 = vmul.f32 0.2, %v60_v14  ;;  %v75_v25 = vor.u32 1.1754944e-38, %v74_v18  ;;  %vm73_vm4 = vcmp.eq.f32.partialorder %v72_v20, 8.507059e+37 }
 0x109   :  { %v133_v15 = vpop.eup %132 }
 0x10a   :  { %v64_v16 = vmul.f32 %v133_v15, %v52_v13  ;;  %vm69_vm1 = vweird.f32 %v133_v15  ;;  %v135_v24 = vpop.eup %134 }
 0x10b   :  { %vm70_vm3 = vmor %vm68_vm2, %vm69_vm1  ;;  %v79_v30 = vmul.f32 0.6931472, %v135_v24 }
 0x10c   :  { %v65_v17 = vsub.f32 1.0, %v64_v16  ;;  %v56_v21 = vpop.xlane.xlu1 %55 }
 0x10d   :  { %v62_v26 = vsub.f32 %v56_v21, %v61_v22 }
 0x10e   :  { %v66_v19 = vmul.f32 %v133_v15, %v65_v17 }
 0x110   :  { %v67_v23 = vadd.f32 %v133_v15, %v66_v19 }
 0x112   :  { %v71_v27 = vsel %vm70_vm3, %v133_v15, %v67_v23 }
 0x113   :  { %v76_v28 = vsel %vm73_vm4, %v75_v25, %v71_v27 }
 0x114   :  { %v77_v29 = vmul.f32 %v76_v28, %v62_v26 }
 0x116   :  { %v80_v31 = vsub.f32 %v77_v29, %v79_v30 }
 0x118   :  { %v89_v32 = vsel %vm88_vm5, %v80_v31, 0.0 }
 0x119   :  { %90 = vadd.xlane.f32.xlu2 %v89_v32 }
 0x18c   :  { %v91_v33 = vpop.xlane.xlu2 %90 }
 0x18d   :  { %v92_v34 = vrot.slane %v91_v33, 4 }
 0x18f   :  { %v93_v35 = vadd.f32 %v92_v34, %v91_v33 }
 0x191   :  { %v94_v36 = vrot.slane %v93_v35, 2 }
 0x193   :  { %v95_v37 = vadd.f32 %v94_v36, %v93_v35 }
 0x195   :  { %v96_v38 = vrot.slane %v95_v37, 1 }
 0x197   :  { %v97_v39 = vadd.f32 %v96_v38, %v95_v37 }
 0x199   :  { %125 = vpush %v97_v39 }
 0x1ca   :  { %s126_s22 = spop %125 }
 0x1cb   :  { %v104_v43 = vstv %s126_s22 }
 0x1cc   :  { %v105_v44 = vsel %vm103_vm8, %v104_v43, 0.0 }
 0x1cd   :  { %106 = vst [vmem:[#allocation7] sm:$0xff] %v105_v44 }
 0x1ce   :  { %117 = dma.vmem_to_hbm [thread:$0]  %s113_s1, 128, %s115_s21, [#allocation4]  }
 0x1cf   :  { %212 = dma.done.wait [#allocation4], 128  }
 0x1d0   :  { %213 = vsyncadd [#allocation4], 4294967168 }
 0x1d1   :  { %122 = vsyncpa [#allocation3], 1 }
 0x1d2   :  { %123 = vsyncpa [#allocation6], 1 }
 0x1d3   :  { %124 = vsyncpa [#allocation4], 1 }

</bundles_post_ra>
